<compile_context>
chip_gen: v6e
topology: v6e:2x2x1
jax: 0.10.0
libtpu: 0.0.40
codegen_flags: <defaults>
</compile_context>

<pallas_src>
import math

import jax
import jax.numpy as jnp
from jax.experimental import pallas as pl
from jax.experimental.pallas import tpu as pltpu

NUM_GROUPS = 8      # nn.GroupNorm(8, channels) -- mathematically dead here (see header)
GN_EPS = 1e-5
LN_EPS = 1e-5


# --------------------------------------------------------------------------------------
# Kernel 1: text-side work, run once per batch (hoisted out of the per-sample grid).
#   bias[b, :] = W_out @ (W_v @ LayerNorm(text_emb[b])) + b_out
# --------------------------------------------------------------------------------------
def _text_bias_kernel(text_ref, ln_g_ref, ln_b_ref, wv_t_ref, wout_t_ref, bout_ref,
                      bias_ref):
    t = text_ref[...].astype(jnp.float32)                                 # [B, T]
    # LayerNorm over T (two-pass, numerically stable; biased variance like nn.LayerNorm)
    mean = jnp.mean(t, axis=1, keepdims=True)                             # [B, 1]
    tc = t - mean
    var = jnp.mean(tc * tc, axis=1, keepdims=True)                        # [B, 1]
    tn = tc * jax.lax.rsqrt(var + LN_EPS) * ln_g_ref[...] + ln_b_ref[...]  # [B, T]
    # V projection and output projection, pre-fused with the output bias.
    v = jnp.dot(tn, wv_t_ref[...], preferred_element_type=jnp.float32)    # [B, C]
    bias_ref[...] = (jnp.dot(v, wout_t_ref[...],
                             preferred_element_type=jnp.float32)
                     + bout_ref[...])                                      # [B, C]


# --------------------------------------------------------------------------------------
# Kernel 2: lane-dense residual broadcast-add on the [B, C*L] slab.
#   out[b, c*L + l] = x[b, c*L + l] + bias[b, c]
# The bias is expanded onto the C*L lane axis with one small MXU matmul against a
# precomputed one-hot expansion matrix (expand[c, c*L + l] == 1).
# --------------------------------------------------------------------------------------
def _residual_bias_add_kernel(x_ref, bias_ref, expand_ref, o_ref):
    bias_wide = jnp.dot(bias_ref[...], expand_ref[...],
                        preferred_element_type=jnp.float32)                # [bb, C*L]
    o_ref[...] = (x_ref[...].astype(jnp.float32) + bias_wide).astype(o_ref.dtype)


def cross_attention_block_1d(x, text_emb, gn_gamma, gn_beta, ln_gamma, ln_beta,
                             w_q, w_k, w_v, w_out, b_out, *, num_heads):
    """x: [B, C, L]; text_emb: [B, T].  Weights follow PyTorch conventions:
       gn_gamma/gn_beta: [C], ln_gamma/ln_beta: [T],
       w_q: [C, C] (Conv1d 1x1, no bias), w_k/w_v: [C, T] (Linear, no bias),
       w_out: [C, C] (Conv1d 1x1), b_out: [C]."""
    B, C, L = x.shape
    T = text_emb.shape[1]
    assert C % num_heads == 0 and C % NUM_GROUPS == 0

    # GroupNorm params, W_q and W_k only feed the attention scores; with one text
    # token the softmax is identically 1, so they cannot affect the output (accepted
    # for interface fidelity, intentionally unused).
    del gn_gamma, gn_beta, w_q, w_k

    # ---- tiny weight-sized preprocessing hoisted to the wrapper ----
    ln_g_r = ln_gamma.reshape(1, T).astype(jnp.float32)
    ln_b_r = ln_beta.reshape(1, T).astype(jnp.float32)
    wv_t = jnp.transpose(w_v).astype(jnp.float32)                          # [T, C]
    wout_t = jnp.transpose(w_out).astype(jnp.float32)                      # [C, C]
    bout_r = b_out.reshape(1, C).astype(jnp.float32)

    # ---- per-sample additive bias (text-only path), one Pallas call for the batch ----
    bias = pl.pallas_call(
        _text_bias_kernel,
        out_shape=jax.ShapeDtypeStruct((B, C), jnp.float32),
        grid=(1,),
        in_specs=[
            pl.BlockSpec((B, T), lambda i: (0, 0)),
            pl.BlockSpec((1, T), lambda i: (0, 0)),
            pl.BlockSpec((1, T), lambda i: (0, 0)),
            pl.BlockSpec((T, C), lambda i: (0, 0)),
            pl.BlockSpec((C, C), lambda i: (0, 0)),
            pl.BlockSpec((1, C), lambda i: (0, 0)),
        ],
        out_specs=pl.BlockSpec((B, C), lambda i: (0, 0)),
    )(text_emb, ln_g_r, ln_b_r, wv_t, wout_t, bout_r)

    # ---- lane-dense residual broadcast-add ----
    CL = C * L
    x_flat = x.reshape(B, CL)                                              # free (contiguous)
    # one-hot expansion matrix: expand[c, n] = 1 iff n // L == c  (hoisted constant)
    expand = (jnp.arange(C)[:, None] == (jnp.arange(CL) // L)[None, :]).astype(jnp.float32)

    bb = B if B <= 8 else 8      # fuse the small batch into one step; block larger batches
    out_flat = pl.pallas_call(
        _residual_bias_add_kernel,
        out_shape=jax.ShapeDtypeStruct((B, CL), x.dtype),
        grid=(pl.cdiv(B, bb),),
        in_specs=[
            pl.BlockSpec((bb, CL), lambda i: (i, 0)),                      # x slab (lane-dense)
            pl.BlockSpec((bb, C), lambda i: (i, 0)),                       # per-sample bias
            pl.BlockSpec((C, CL), lambda i: (0, 0)),                       # constant expansion
        ],
        out_specs=pl.BlockSpec((bb, CL), lambda i: (i, 0)),
        compiler_params=pltpu.CompilerParams(
            dimension_semantics=("parallel",)),       # batch-blocks: both v7x TCs busy
    )(x_flat, bias, expand)

    return out_flat.reshape(B, C, L)


def _reference(x, text_emb, gn_gamma, gn_beta, ln_gamma, ln_beta,
               w_q, w_k, w_v, w_out, b_out, num_heads):
    """Pure-JAX reference mirroring the PyTorch forward exactly (eval mode),
    including the (mathematically dead) GroupNorm / Q / score / softmax path."""
    B, C, L = x.shape
    G, Cg = NUM_GROUPS, C // NUM_GROUPS
    hd = C // num_heads
    xg = x.reshape(B, G, Cg, L)
    mean = xg.mean(axis=(2, 3), keepdims=True)
    var = xg.var(axis=(2, 3), keepdims=True)
    xn = ((xg - mean) / jnp.sqrt(var + GN_EPS)).reshape(B, C, L)
    xn = xn * gn_gamma[None, :, None] + gn_beta[None, :, None]
    tm = text_emb.mean(axis=-1, keepdims=True)
    tv = text_emb.var(axis=-1, keepdims=True)
    tn = (text_emb - tm) / jnp.sqrt(tv + LN_EPS) * ln_gamma[None, :] + ln_beta[None, :]
    q = jnp.einsum('oc,bcl->bol', w_q, xn)                               # [B, C, L]
    k = tn @ w_k.T                                                       # [B, C]
    v = tn @ w_v.T                                                       # [B, C]
    qh = q.reshape(B, num_heads, hd, L).transpose(0, 1, 3, 2)            # [B, H, L, hd]
    kh = k.reshape(B, num_heads, hd, 1).transpose(0, 1, 3, 2)            # [B, H, 1, hd]
    vh = v.reshape(B, num_heads, hd, 1).transpose(0, 1, 3, 2)            # [B, H, 1, hd]
    s = jnp.einsum('bhld,bhkd->bhlk', qh, kh) / math.sqrt(hd)            # [B, H, L, 1]
    p = jax.nn.softmax(s, axis=-1)
    o = jnp.einsum('bhlk,bhkd->bhld', p, vh)                             # [B, H, L, hd]
    o = o.transpose(0, 1, 3, 2).reshape(B, C, L)
    out = jnp.einsum('oc,bcl->bol', w_out, o) + b_out[None, :, None]
    return out + x                                                       # dropout = identity (eval)


if __name__ == "__main__":
    B, C, L, T = 2, 32, 16, 64
    NUM_HEADS = 8

    key = jax.random.PRNGKey(0)
    keys = jax.random.split(key, 11)
    x = jax.random.normal(keys[0], (B, C, L), dtype=jnp.float32)
    text_emb = jax.random.normal(keys[1], (B, T), dtype=jnp.float32)
    gn_gamma = 1.0 + 0.1 * jax.random.normal(keys[2], (C,), dtype=jnp.float32)
    gn_beta = 0.1 * jax.random.normal(keys[3], (C,), dtype=jnp.float32)
    ln_gamma = 1.0 + 0.1 * jax.random.normal(keys[4], (T,), dtype=jnp.float32)
    ln_beta = 0.1 * jax.random.normal(keys[5], (T,), dtype=jnp.float32)
    w_q = 0.1 * jax.random.normal(keys[6], (C, C), dtype=jnp.float32)     # Conv1d(C, C, 1, bias=False)
    w_k = 0.1 * jax.random.normal(keys[7], (C, T), dtype=jnp.float32)     # Linear(T, C, bias=False)
    w_v = 0.1 * jax.random.normal(keys[8], (C, T), dtype=jnp.float32)     # Linear(T, C, bias=False)
    w_out = 0.1 * jax.random.normal(keys[9], (C, C), dtype=jnp.float32)   # Conv1d(C, C, 1)
    b_out = 0.1 * jax.random.normal(keys[10], (C,), dtype=jnp.float32)

    out = cross_attention_block_1d(x, text_emb, gn_gamma, gn_beta, ln_gamma, ln_beta,
                                   w_q, w_k, w_v, w_out, b_out, num_heads=NUM_HEADS)
    out = jax.block_until_ready(out)

    ref = _reference(x, text_emb, gn_gamma, gn_beta, ln_gamma, ln_beta,
                     w_q, w_k, w_v, w_out, b_out, NUM_HEADS)
    assert out.shape == (B, C, L)
    err = jnp.max(jnp.abs(out - ref))
    assert jnp.allclose(out, ref, atol=1e-4, rtol=1e-4), f"max abs err {err}"
    print("KERNEL_OK")
</pallas_src>

<mosaic_0001>
module attributes {stable_mosaic.version = 11 : i64} {
  func.func @_text_bias_kernel(%arg0: i32, %arg1: memref<2x64xf32, #tpu.memory_space<vmem>>, %arg2: memref<1x64xf32, #tpu.memory_space<vmem>>, %arg3: memref<1x64xf32, #tpu.memory_space<vmem>>, %arg4: memref<64x32xf32, #tpu.memory_space<vmem>>, %arg5: memref<32x32xf32, #tpu.memory_space<vmem>>, %arg6: memref<1x32xf32, #tpu.memory_space<vmem>>, %arg7: memref<2x32xf32, #tpu.memory_space<vmem>>) attributes {dimension_semantics = [#tpu.dimension_semantics<arbitrary>], iteration_bounds = array<i64: 1>, scalar_prefetch = 0 : i64, scratch_operands = 0 : i64, tpu.core_type = #tpu.core_type<tc>, window_params = [{pipeline_mode = #tpu.pipeline_mode<synchronous>, transform_indices = @transform_0, window_bounds = array<i64: 2, 64>}, {pipeline_mode = #tpu.pipeline_mode<synchronous>, transform_indices = @transform_1, window_bounds = array<i64: 1, 64>}, {pipeline_mode = #tpu.pipeline_mode<synchronous>, transform_indices = @transform_2, window_bounds = array<i64: 1, 64>}, {pipeline_mode = #tpu.pipeline_mode<synchronous>, transform_indices = @transform_3, window_bounds = array<i64: 64, 32>}, {pipeline_mode = #tpu.pipeline_mode<synchronous>, transform_indices = @transform_4, window_bounds = array<i64: 32, 32>}, {pipeline_mode = #tpu.pipeline_mode<synchronous>, transform_indices = @transform_5, window_bounds = array<i64: 1, 32>}, {pipeline_mode = #tpu.pipeline_mode<synchronous>, transform_indices = @transform_6, window_bounds = array<i64: 2, 32>}]} {
    %c0 = arith.constant 0 : index
    %c0_0 = arith.constant 0 : index
    %0 = vector.load %arg1[%c0, %c0_0] : memref<2x64xf32, #tpu.memory_space<vmem>>, vector<2x64xf32>
    %cst = arith.constant dense<0.000000e+00> : vector<2xf32>
    %1 = vector.multi_reduction <add>, %0, %cst [1] : vector<2x64xf32> to vector<2xf32>
    %2 = vector.shape_cast %1 : vector<2xf32> to vector<2x1xf32>
    %cst_1 = arith.constant 6.400000e+01 : f32
    %3 = vector.broadcast %cst_1 : f32 to vector<2x1xf32>
    %4 = arith.divf %2, %3 : vector<2x1xf32>
    %5 = vector.broadcast %4 : vector<2x1xf32> to vector<2x64xf32>
    %6 = arith.subf %0, %5 : vector<2x64xf32>
    %7 = arith.mulf %6, %6 : vector<2x64xf32>
    %cst_2 = arith.constant dense<0.000000e+00> : vector<2xf32>
    %8 = vector.multi_reduction <add>, %7, %cst_2 [1] : vector<2x64xf32> to vector<2xf32>
    %9 = vector.shape_cast %8 : vector<2xf32> to vector<2x1xf32>
    %cst_3 = arith.constant 6.400000e+01 : f32
    %10 = vector.broadcast %cst_3 : f32 to vector<2x1xf32>
    %11 = arith.divf %9, %10 : vector<2x1xf32>
    %cst_4 = arith.constant 9.99999974E-6 : f32
    %12 = vector.broadcast %cst_4 : f32 to vector<2x1xf32>
    %13 = arith.addf %11, %12 : vector<2x1xf32>
    %14 = math.rsqrt %13 : vector<2x1xf32>
    %15 = vector.broadcast %14 : vector<2x1xf32> to vector<2x64xf32>
    %16 = arith.mulf %6, %15 : vector<2x64xf32>
    %c0_5 = arith.constant 0 : index
    %c0_6 = arith.constant 0 : index
    %17 = vector.load %arg2[%c0_5, %c0_6] : memref<1x64xf32, #tpu.memory_space<vmem>>, vector<1x64xf32>
    %18 = vector.broadcast %17 : vector<1x64xf32> to vector<2x64xf32>
    %19 = arith.mulf %16, %18 : vector<2x64xf32>
    %c0_7 = arith.constant 0 : index
    %c0_8 = arith.constant 0 : index
    %20 = vector.load %arg3[%c0_7, %c0_8] : memref<1x64xf32, #tpu.memory_space<vmem>>, vector<1x64xf32>
    %21 = vector.broadcast %20 : vector<1x64xf32> to vector<2x64xf32>
    %22 = arith.addf %19, %21 : vector<2x64xf32>
    %c0_9 = arith.constant 0 : index
    %c0_10 = arith.constant 0 : index
    %23 = vector.load %arg4[%c0_9, %c0_10] : memref<64x32xf32, #tpu.memory_space<vmem>>, vector<64x32xf32>
    %cst_11 = arith.constant dense<0.000000e+00> : vector<2x32xf32>
    %24 = tpu.matmul %22, %23, %cst_11 {dimension_numbers = #tpu.dot_dimension_numbers<[1], [0], [0], [1], [0, 0, 1, 1], [], []>} : vector<2x64xf32>, vector<64x32xf32>, vector<2x32xf32> -> vector<2x32xf32>
    %c0_12 = arith.constant 0 : index
    %c0_13 = arith.constant 0 : index
    %25 = vector.load %arg5[%c0_12, %c0_13] : memref<32x32xf32, #tpu.memory_space<vmem>>, vector<32x32xf32>
    %cst_14 = arith.constant dense<0.000000e+00> : vector<2x32xf32>
    %26 = tpu.matmul %24, %25, %cst_14 {dimension_numbers = #tpu.dot_dimension_numbers<[1], [0], [0], [1], [0, 0, 1, 1], [], []>} : vector<2x32xf32>, vector<32x32xf32>, vector<2x32xf32> -> vector<2x32xf32>
    %c0_15 = arith.constant 0 : index
    %c0_16 = arith.constant 0 : index
    %27 = vector.load %arg6[%c0_15, %c0_16] : memref<1x32xf32, #tpu.memory_space<vmem>>, vector<1x32xf32>
    %28 = vector.broadcast %27 : vector<1x32xf32> to vector<2x32xf32>
    %29 = arith.addf %26, %28 : vector<2x32xf32>
    %c0_17 = arith.constant 0 : index
    %c0_18 = arith.constant 0 : index
    %30 = vector.load %arg7[%c0_17, %c0_18] : memref<2x32xf32, #tpu.memory_space<vmem>>, vector<2x32xf32>
    tpu.vector_store %arg7[%c0_17, %c0_18], %29 {strides = array<i32>} : memref<2x32xf32, #tpu.memory_space<vmem>>, vector<2x32xf32>,
    return
  }
  func.func @transform_0(%arg0: i32) -> (i32, i32) {
    %c0_i32 = arith.constant 0 : i32
    %c0_i32_0 = arith.constant 0 : i32
    %c0_i32_1 = arith.constant 0 : i32
    return %c0_i32, %c0_i32_0 : i32, i32
  }
  func.func @transform_1(%arg0: i32) -> (i32, i32) {
    %c0_i32 = arith.constant 0 : i32
    %c0_i32_0 = arith.constant 0 : i32
    %c0_i32_1 = arith.constant 0 : i32
    return %c0_i32, %c0_i32_0 : i32, i32
  }
  func.func @transform_2(%arg0: i32) -> (i32, i32) {
    %c0_i32 = arith.constant 0 : i32
    %c0_i32_0 = arith.constant 0 : i32
    %c0_i32_1 = arith.constant 0 : i32
    return %c0_i32, %c0_i32_0 : i32, i32
  }
  func.func @transform_3(%arg0: i32) -> (i32, i32) {
    %c0_i32 = arith.constant 0 : i32
    %c0_i32_0 = arith.constant 0 : i32
    %c0_i32_1 = arith.constant 0 : i32
    return %c0_i32, %c0_i32_0 : i32, i32
  }
  func.func @transform_4(%arg0: i32) -> (i32, i32) {
    %c0_i32 = arith.constant 0 : i32
    %c0_i32_0 = arith.constant 0 : i32
    %c0_i32_1 = arith.constant 0 : i32
    return %c0_i32, %c0_i32_0 : i32, i32
  }
  func.func @transform_5(%arg0: i32) -> (i32, i32) {
    %c0_i32 = arith.constant 0 : i32
    %c0_i32_0 = arith.constant 0 : i32
    %c0_i32_1 = arith.constant 0 : i32
    return %c0_i32, %c0_i32_0 : i32, i32
  }
  func.func @transform_6(%arg0: i32) -> (i32, i32) {
    %c0_i32 = arith.constant 0 : i32
    %c0_i32_0 = arith.constant 0 : i32
    %c0_i32_1 = arith.constant 0 : i32
    return %c0_i32, %c0_i32_0 : i32, i32
  }
}

</mosaic_0001>

<bundles_post_ra>
// kernel: tpu_custom_call.1
= control target key start
LH: loop header
LB: loop body
LE: loop exit
PB: predicated region body
PF: predicated region fallthrough
CT: control target
= control target key end

     0   :  { %vm25_vm0 = vcmask 517120   ;;  %s404_s0 = inlined_call_operand.vmem [shape: f32[2,64], index: 0, kind: input, shape index: {}]   ;;  %s405_s1 = inlined_call_operand.vmem [shape: f32[1,64], index: 1, kind: input, shape index: {}]   ;;  %s406_s2 = inlined_call_operand.vmem [shape: f32[1,64], index: 2, kind: input, shape index: {}]   ;;  %s407_s3 = inlined_call_operand.vmem [shape: f32[64,32], index: 3, kind: input, shape index: {}]   ;;  %s408_s4 = inlined_call_operand.vmem [shape: f32[32,32], index: 4, kind: input, shape index: {}]   ;;  %s409_s5 = inlined_call_operand.vmem [shape: f32[1,32], index: 5, kind: input, shape index: {}]   ;;  %s410_s6 = inlined_call_operand.hbm [shape: f32[2,32], index: 6, kind: output, shape index: {}]  }
   0x1   :  { %v24_v0 = vld [vmem:[%s404_s0] sm:$0x3] }
   0x2   :  { %11 = vsyncpa [#allocation3], 0  ;;  %v26_v1 = vsel %vm25_vm0, %v24_v0, 0.0  ;;  %v63_v7 = vld [vmem:[%s407_s3 + $0x38] sm:$0xff]  ;;  %v315_v8 = vmov 0.0   ;;  %v62_v9 = vld [vmem:[%s407_s3 + $0x30] sm:$0xff] }
   0x3   :  { %27 = vadd.xlane.f32.xlu0 %v26_v1  ;;  %258 = vmatprep.subr.mxu0 %v315_v8  ;;  %vm316_vm1 = vmmov 0   ;;  %v61_v10 = vld [vmem:[%s407_s3 + $0x28] sm:$0xff]  ;;  %v60_v11 = vld [vmem:[%s407_s3 + $0x20] sm:$0xff]  ;;  %v59_v12 = vld [vmem:[%s407_s3 + $0x18] sm:$0xff]  ;;  %vm64_vm2 = vcmask 523264   ;;  %vm149_vm3 = vcmask 261120  }
   0x4   :  { %274 = vmatprep.mubr.msk.f32.mxu0 %vm316_vm1, %v315_v8  ;;  %259 = vmatpush3.msra.mxu0 %v63_v7  ;;  %v58_v13 = vld [vmem:[%s407_s3 + $0x10] sm:$0xff]  ;;  %v57_v14 = vld [vmem:[%s407_s3 + $0x8] sm:$0xff]  ;;  %v56_v15 = vld [vmem:[%s407_s3] sm:$0xff]  ;;  %s317_s26 = smov [#allocation2]   ;;  %vm223_vm4 = vcmask 254976  }
   0x5   :  { %277 = vmatprep.subr.mxu1 %v315_v8  ;;  %260 = vmatprep.subr.mxu0 %v315_v8  ;;  %v141_v16 = vld [vmem:[%s408_s4 + $0x18] sm:$0xff]  ;;  %v140_v17 = vld [vmem:[%s408_s4 + $0x10] sm:$0xff]  ;;  %v139_v18 = vld [vmem:[%s408_s4 + $0x8] sm:$0xff]  ;;  %s231_s0 = sshll.u32 %s317_s26, 4  ;;  %s232_s0 = int_to_ptr.vmem [resolvable:$true] %s231_s0 }
   0x6   :  { %285 = vmatprep.mubr.msk.f32.mxu1 %vm316_vm1, %v315_v8  ;;  %261 = vmatpush3.msra.mxu0 %v62_v9  ;;  %v239_v23 = vld [vmem:[%s405_s1] ss:$0 sm:$0xff]  ;;  %p298_p1 = scmp.lt.s32.totalorder %s232_s0, %s232_s0 }
   0x7   :  { %262 = vmatprep.subr.mxu0 %v315_v8  ;;  %278 = vmatpush3.msra.mxu1 %v141_v16  ;;  %v240_v25 = vld [vmem:[%s406_s2] ss:$0 sm:$0xff]  ;;  %s293_s2 = scalar_lea.vmem %s232_s0, 32 }
   0x8   :  { %263 = vmatpush3.msra.mxu0 %v61_v10  ;;  %279 = vmatprep.subr.mxu1 %v315_v8  ;;  %v138_v28 = vld [vmem:[%s408_s4] sm:$0xff]  ;;  %p294_p0 = scmp.ne.s32.totalorder %s232_s0, %s293_s2  ;;  %p299_p2 = scmp.lt.s32.totalorder %s293_s2, %s293_s2 }
   0x9   :  { %264 = vmatprep.subr.mxu0 %v315_v8  ;;  %280 = vmatpush3.msra.mxu1 %v140_v17  ;;  %v242_v31 = vld [vmem:[%s409_s5] ss:$0 sm:$0xff] }
   0xa   :  { %265 = vmatpush3.msra.mxu0 %v60_v11  ;;  %281 = vmatprep.subr.mxu1 %v315_v8  ;;  %p300_p3 = por %p299_p2, %p298_p1 }
   0xb   :  { %266 = vmatprep.subr.mxu0 %v315_v8  ;;  %282 = vmatpush3.msra.mxu1 %v139_v18 }
   0xc   :  { %267 = vmatpush3.msra.mxu0 %v59_v12  ;;  %283 = vmatprep.subr.mxu1 %v315_v8  ;;  %p301_p4 = pnand %p300_p3, %p294_p0 }
   0xd   :  { %268 = vmatprep.subr.mxu0 %v315_v8  ;;  %284 = vmatpush3.msra.mxu1 %v138_v28 }
   0xe   :  { %269 = vmatpush3.msra.mxu0 %v58_v13 }
   0xf   :  { %270 = vmatprep.subr.mxu0 %v315_v8 }
  0x10   :  { %271 = vmatpush3.msra.mxu0 %v57_v14 }
  0x11   :  { %272 = vmatprep.subr.mxu0 %v315_v8 }
  0x12   :  { %273 = vmatpush3.msra.mxu0 %v56_v15 }
  0x8c   :  { %v28_v2 = vpop.xlane.xlu0 %27 }
  0x8d   :  { %v30_v3 = vmul.f32 0.015625, %v28_v2 }
  0x8f   :  { %v31_v4 = vsub.f32 %v24_v0, %v30_v3 }
  0x91   :  { %v32_v5 = vmul.f32 %v31_v4, %v31_v4 }
  0x93   :  { %v33_v6 = vsel %vm25_vm0, %v32_v5, 0.0 }
  0x94   :  { %34 = vadd.xlane.f32.xlu0 %v33_v6 }
 0x11d   :  { %v35_v19 = vpop.xlane.xlu0 %34 }
 0x11e   :  { %v36_v20 = vmul.f32 0.015625, %v35_v19 }
 0x120   :  { %v37_v21 = vadd.f32 1e-05, %v36_v20 }
 0x122   :  { %291 = vrsqrt.f32 %v37_v21 }
 0x12f   :  { %v292_v22 = vpop.eup %291 }
 0x130   :  { %v39_v24 = vmul.f32 %v292_v22, %v31_v4 }
 0x132   :  { %v47_v26 = vmul.f32 %v239_v23, %v39_v24 }
 0x134   :  { %v55_v27 = vadd.f32 %v240_v25, %v47_v26 }
 0x136   :  { %275 = vmatmul.mubr.msk.f32.vlgmr.msra.gmra.mxu0 %vm64_vm2, %v55_v27 }
 0x1f6   :  { %v134_v29 = vpop.f32.mrf.mxu0 }
 0x1f7   :  { %286 = vmatmul.mubr.msk.f32.vlgmr.msra.gmra.mxu1 %vm149_vm3, %v134_v29 }
 0x1f8   :  { %v276_v30 = vpop.f32.mrf.mxu0 }
 0x2b7   :  { %v219_v32 = vpop.f32.mrf.mxu1 }
 0x2b8   :  { %v220_v33 = vadd.f32 %v242_v31, %v219_v32 }
 0x2b9   :  { %v287_v34 = vpop.f32.mrf.mxu1 }
 0x2ba   :  { %224 = vst.msk [vmem:[#allocation2] sm:$0x3] %vm223_vm4, %v220_v33 }
 0x2bb   :  { %304 = shalt.err (!%p301_p4)
}
 0x2bc   :  { %234 = dma.vmem_to_hbm [thread:$0]  %s232_s0, 32, %s410_s6, [#allocation3]  }
 0x2bd   :  { %313 = dma.done.wait [#allocation3], 32  }
 0x2be   :  { %314 = vsyncadd [#allocation3], 4294967264 }
 0x2bf   :  { %238 = vsyncpa [#allocation3], 1 }

</bundles_post_ra>
